<compile_context>
chip_gen: v6e
topology: v6e:2x2x1
jax: 0.10.0
libtpu: 0.0.40
codegen_flags: <defaults>
</compile_context>

<pallas_src>
import jax
import jax.numpy as jnp
from jax.experimental import pallas as pl
from jax.experimental.pallas import tpu as pltpu


_SQRT_2_OVER_PI = 0.7978845608028654


def _gelu_new(x):
    # HuggingFace "gelu_new": 0.5*x*(1+tanh(sqrt(2/pi)*(x+0.044715*x^3)))
    return 0.5 * x * (1.0 + jnp.tanh(_SQRT_2_OVER_PI * (x + 0.044715 * x * x * x)))


def phi_mlp_kernel(x_ref, w1_ref, b1_ref, w2_ref, b2_ref, o_ref, acc_ref):
    """Grid = (row_tiles, I_chunks).  Axis 1 is the reduction over I."""
    k = pl.program_id(1)

    @pl.when(k == 0)
    def _init():
        acc_ref[...] = jnp.zeros_like(acc_ref)

    # fc1 chunk: [tm, H] @ [H, tI] -> f32 on the MXU; bias + gelu in f32.
    h = jnp.dot(x_ref[...], w1_ref[...], preferred_element_type=jnp.float32)
    h = h + b1_ref[...].astype(jnp.float32)
    a = _gelu_new(h)

    # fc2 partial: [tm, tI] @ [tI, H], accumulated into the f32 scratch.
    acc_ref[...] += jnp.dot(a.astype(w2_ref.dtype), w2_ref[...],
                            preferred_element_type=jnp.float32)

    @pl.when(k == pl.num_programs(1) - 1)
    def _finalize():
        out = acc_ref[...] + b2_ref[...].astype(jnp.float32)
        o_ref[...] = out.astype(o_ref.dtype)


def _round_up(x, m):
    return ((x + m - 1) // m) * m


# (row tile target, intermediate-chunk target, per-core VMEM bytes)
_GEN_DEFAULTS = {
    "v5e": (512, 4096, 128 * 1024 * 1024),
    "v6e": (1024, 2048, 128 * 1024 * 1024),
    "v7x": (768, 1024, 64 * 1024 * 1024),
    "unknown": (512, 1024, 64 * 1024 * 1024),  # conservative: assume 64 MiB VMEM
}


def _detect_generation():
    try:
        kind = jax.devices()[0].device_kind.lower()
    except Exception:
        return "unknown"
    if "v7" in kind or "7x" in kind:
        return "v7x"
    if "v6" in kind:
        return "v6e"
    if "v5" in kind:
        return "v5e"
    return "unknown"


def _pick_ti(intermediate, cap):
    """Largest legal intermediate chunk <= cap.

    Returns (ti, padded_intermediate).  Zero-padding the intermediate dim is
    exact for this MLP (gelu_new(0) == 0 and padded W2 rows are zero).
    """
    cap = max(128, (cap // 128) * 128)
    if intermediate <= cap:
        return intermediate, intermediate          # take it whole (always legal)
    for mult in range(cap // 128, 0, -1):
        ti = mult * 128
        if intermediate % ti == 0:
            return ti, intermediate                 # aligned divisor
    return cap, _round_up(intermediate, cap)        # pad I up to a multiple of cap


def _select_tiles(M, H, I, itemsize, gen, tm_req, ti_req, vmem_req):
    """Generation- and dtype-aware tile selection under an explicit VMEM budget."""
    tm_def, ti_def, cap = _GEN_DEFAULTS[gen]
    tm_target = tm_def if tm_req is None else tm_req
    ti_target = ti_def if ti_req is None else ti_req
    vmem_limit = int(cap * 0.82) if vmem_req is None else int(vmem_req)
    budget = vmem_limit

    tm = min(_round_up(tm_target, 8), _round_up(M, 8))
    tm = max(tm, 8)
    while True:
        # Per-step VMEM: double-buffered x/out tiles + f32 accumulator (fixed
        # in ti), plus per-ti-element cost of the double-buffered W1/W2 chunks,
        # the f32 intermediate/gelu temporaries and the b1 chunk.
        fixed = 2 * 2 * tm * H * itemsize + tm * H * 4
        per_ti = 4 * H * itemsize + tm * 8 + 4 * itemsize
        avail = budget - fixed
        if avail < 128 * per_ti and tm > 128:
            tm = _round_up(max(128, tm // 2), 8)
            continue
        cand = avail // per_ti if avail > 0 else 0
        ti_cap = max(128, min(ti_target, int(cand)))
        break

    ti, I_pad = _pick_ti(I, ti_cap)
    return tm, ti, I_pad, vmem_limit


def phi_mlp(hidden_states, w1, b1, w2, b2, *, tm=None, ti=None,
            vmem_limit_bytes=None):
    """hidden_states: [B, S, H]; w1: [H, I]; b1: [I]; w2: [I, H]; b2: [H].

    tm / ti / vmem_limit_bytes: optional overrides; None = auto (per TPU
    generation and dtype).
    """
    B, S, H = hidden_states.shape
    I = w1.shape[1]
    M = B * S

    gen = _detect_generation()
    itemsize = max(hidden_states.dtype.itemsize, w1.dtype.itemsize,
                   w2.dtype.itemsize)
    tm_eff, ti_eff, I_pad, vmem_limit = _select_tiles(
        M, H, I, itemsize, gen, tm, ti, vmem_limit_bytes)

    x2d = hidden_states.reshape(M, H)
    if I_pad != I:
        # Zero padding of the intermediate dim is exact (see _pick_ti).
        w1 = jnp.pad(w1, ((0, 0), (0, I_pad - I)))
        b1 = jnp.pad(b1, ((0, I_pad - I),))
        w2 = jnp.pad(w2, ((0, I_pad - I), (0, 0)))
    b1_2d = b1.reshape(1, I_pad)
    b2_2d = b2.reshape(1, H)

    # Row axis uses pl.cdiv + Pallas partial-block masking (no host pad/slice);
    # masked rows never mix with valid rows (matmul/bias/gelu are row-local).
    grid = (pl.cdiv(M, tm_eff), I_pad // ti_eff)

    out2d = pl.pallas_call(
        phi_mlp_kernel,
        out_shape=jax.ShapeDtypeStruct((M, H), hidden_states.dtype),
        grid_spec=pltpu.PrefetchScalarGridSpec(
            num_scalar_prefetch=0,
            grid=grid,
            in_specs=[
                pl.BlockSpec((tm_eff, H), lambda i, k: (i, 0)),    # x rows
                pl.BlockSpec((H, ti_eff), lambda i, k: (0, k)),    # W1 chunk (streams)
                pl.BlockSpec((1, ti_eff), lambda i, k: (0, k)),    # b1 chunk
                pl.BlockSpec((ti_eff, H), lambda i, k: (k, 0)),    # W2 chunk (streams)
                pl.BlockSpec((1, H), lambda i, k: (0, 0)),         # b2
            ],
            out_specs=pl.BlockSpec((tm_eff, H), lambda i, k: (i, 0)),
            scratch_shapes=[pltpu.VMEM((tm_eff, H), jnp.float32)],  # f32 accumulator
        ),
        compiler_params=pltpu.CompilerParams(
            dimension_semantics=("parallel", "arbitrary"),
            vmem_limit_bytes=int(vmem_limit),
        ),
    )(x2d, w1, b1_2d, w2, b2_2d)

    return out2d.reshape(B, S, H)


def _reference(hidden_states, w1, b1, w2, b2):
    h = (hidden_states.astype(jnp.float32) @ w1.astype(jnp.float32)
         + b1.astype(jnp.float32))
    a = _gelu_new(h)
    out = a @ w2.astype(jnp.float32) + b2.astype(jnp.float32)
    return out.astype(hidden_states.dtype)


if __name__ == "__main__":
    # Small config consistent with the module: hidden_size=32, intermediate=256.
    batch, seq, hidden, intermediate = 2, 8, 32, 256

    key = jax.random.PRNGKey(0)
    kx, k1, k2, k3, k4 = jax.random.split(key, 5)

    x = jax.random.normal(kx, (batch, seq, hidden), dtype=jnp.float32)
    # Synthetic parameters, stored as [in, out] (already-transposed nn.Linear weights).
    w1 = jax.random.normal(k1, (hidden, intermediate), dtype=jnp.float32) * 0.02
    b1 = jax.random.normal(k2, (intermediate,), dtype=jnp.float32) * 0.02
    w2 = jax.random.normal(k3, (intermediate, hidden), dtype=jnp.float32) * 0.02
    b2 = jax.random.normal(k4, (hidden,), dtype=jnp.float32) * 0.02

    # Test 1: ti forced to 128 -> two reduction steps (exercises acc init/finalize).
    out = jax.block_until_ready(phi_mlp(x, w1, b1, w2, b2, ti=128))
    ref = _reference(x, w1, b1, w2, b2)
    assert out.shape == (batch, seq, hidden)
    assert jnp.allclose(out, ref, atol=2e-5, rtol=1e-5), "mismatch vs reference (test 1)"

    # Test 2: M=24 with tm forced to 16 -> partial (masked) trailing row block.
    x2 = jax.random.normal(k1, (1, 24, hidden), dtype=jnp.float32)
    out2 = jax.block_until_ready(phi_mlp(x2, w1, b1, w2, b2, tm=16))
    ref2 = _reference(x2, w1, b1, w2, b2)
    assert out2.shape == (1, 24, hidden)
    assert jnp.allclose(out2, ref2, atol=2e-5, rtol=1e-5), "mismatch vs reference (test 2)"

    print("KERNEL_OK")
</pallas_src>

<mosaic_0001>
module attributes {stable_mosaic.version = 11 : i64} {
  func.func @phi_mlp_kernel(%arg0: i32, %arg1: i32, %arg2: memref<16x32xf32, #tpu.memory_space<vmem>>, %arg3: memref<32x128xf32, #tpu.memory_space<vmem>>, %arg4: memref<1x128xf32, #tpu.memory_space<vmem>>, %arg5: memref<128x32xf32, #tpu.memory_space<vmem>>, %arg6: memref<1x32xf32, #tpu.memory_space<vmem>>, %arg7: memref<16x32xf32, #tpu.memory_space<vmem>>, %arg8: memref<16x32xf32, #tpu.memory_space<vmem>>) attributes {dimension_semantics = [#tpu.dimension_semantics<parallel>, #tpu.dimension_semantics<arbitrary>], iteration_bounds = array<i64: 1, 2>, scalar_prefetch = 0 : i64, scratch_operands = 1 : i64, tpu.core_type = #tpu.core_type<tc>, window_params = [{transform_indices = @transform_0, window_bounds = array<i64: 16, 32>}, {transform_indices = @transform_1, window_bounds = array<i64: 32, 128>}, {transform_indices = @transform_2, window_bounds = array<i64: 1, 128>}, {transform_indices = @transform_3, window_bounds = array<i64: 128, 32>}, {pipeline_mode = #tpu.pipeline_mode<synchronous>, transform_indices = @transform_4, window_bounds = array<i64: 1, 32>}, {transform_indices = @transform_5, window_bounds = array<i64: 16, 32>}]} {
    %c0_i32 = arith.constant 0 : i32
    %0 = arith.cmpi eq, %arg1, %c0_i32 : i32
    %1 = arith.extui %0 : i1 to i32
    %c0_i32_0 = arith.constant 0 : i32
    %2 = arith.cmpi ne, %1, %c0_i32_0 : i32
    scf.if %2 {
      %cst_18 = arith.constant 0.000000e+00 : f32
      %30 = vector.broadcast %cst_18 : f32 to vector<16x32xf32>
      %c0_19 = arith.constant 0 : index
      %c0_20 = arith.constant 0 : index
      %31 = vector.load %arg8[%c0_19, %c0_20] : memref<16x32xf32, #tpu.memory_space<vmem>>, vector<16x32xf32>
      tpu.vector_store %arg8[%c0_19, %c0_20], %30 {strides = array<i32>} : memref<16x32xf32, #tpu.memory_space<vmem>>, vector<16x32xf32>,
    } else {
    }
    %c0 = arith.constant 0 : index
    %c0_1 = arith.constant 0 : index
    %3 = vector.load %arg2[%c0, %c0_1] : memref<16x32xf32, #tpu.memory_space<vmem>>, vector<16x32xf32>
    %c0_2 = arith.constant 0 : index
    %c0_3 = arith.constant 0 : index
    %4 = vector.load %arg3[%c0_2, %c0_3] : memref<32x128xf32, #tpu.memory_space<vmem>>, vector<32x128xf32>
    %cst = arith.constant dense<0.000000e+00> : vector<16x128xf32>
    %5 = tpu.matmul %3, %4, %cst {dimension_numbers = #tpu.dot_dimension_numbers<[1], [0], [0], [1], [0, 0, 1, 1], [], []>} : vector<16x32xf32>, vector<32x128xf32>, vector<16x128xf32> -> vector<16x128xf32>
    %c0_4 = arith.constant 0 : index
    %c0_5 = arith.constant 0 : index
    %6 = vector.load %arg4[%c0_4, %c0_5] : memref<1x128xf32, #tpu.memory_space<vmem>>, vector<1x128xf32>
    %7 = vector.broadcast %6 : vector<1x128xf32> to vector<16x128xf32>
    %8 = arith.addf %5, %7 : vector<16x128xf32>
    %cst_6 = arith.constant 5.000000e-01 : f32
    %9 = vector.broadcast %cst_6 : f32 to vector<16x128xf32>
    %10 = arith.mulf %9, %8 : vector<16x128xf32>
    %cst_7 = arith.constant 4.471500e-02 : f32
    %11 = vector.broadcast %cst_7 : f32 to vector<16x128xf32>
    %12 = arith.mulf %11, %8 : vector<16x128xf32>
    %13 = arith.mulf %12, %8 : vector<16x128xf32>
    %14 = arith.mulf %13, %8 : vector<16x128xf32>
    %15 = arith.addf %8, %14 : vector<16x128xf32>
    %cst_8 = arith.constant 0.797884583 : f32
    %16 = vector.broadcast %cst_8 : f32 to vector<16x128xf32>
    %17 = arith.mulf %16, %15 : vector<16x128xf32>
    %18 = math.tanh %17 : vector<16x128xf32>
    %cst_9 = arith.constant 1.000000e+00 : f32
    %19 = vector.broadcast %cst_9 : f32 to vector<16x128xf32>
    %20 = arith.addf %19, %18 : vector<16x128xf32>
    %21 = arith.mulf %10, %20 : vector<16x128xf32>
    %c0_10 = arith.constant 0 : index
    %c0_11 = arith.constant 0 : index
    %22 = vector.load %arg8[%c0_10, %c0_11] : memref<16x32xf32, #tpu.memory_space<vmem>>, vector<16x32xf32>
    %c0_12 = arith.constant 0 : index
    %c0_13 = arith.constant 0 : index
    %23 = vector.load %arg5[%c0_12, %c0_13] : memref<128x32xf32, #tpu.memory_space<vmem>>, vector<128x32xf32>
    %cst_14 = arith.constant dense<0.000000e+00> : vector<16x32xf32>
    %24 = tpu.matmul %21, %23, %cst_14 {dimension_numbers = #tpu.dot_dimension_numbers<[1], [0], [0], [1], [0, 0, 1, 1], [], []>} : vector<16x128xf32>, vector<128x32xf32>, vector<16x32xf32> -> vector<16x32xf32>
    %25 = arith.addf %22, %24 : vector<16x32xf32>
    %c0_15 = arith.constant 0 : index
    %c0_16 = arith.constant 0 : index
    %26 = vector.load %arg8[%c0_15, %c0_16] : memref<16x32xf32, #tpu.memory_space<vmem>>, vector<16x32xf32>
    tpu.vector_store %arg8[%c0_15, %c0_16], %25 {strides = array<i32>} : memref<16x32xf32, #tpu.memory_space<vmem>>, vector<16x32xf32>,
    %c1_i32 = arith.constant 1 : i32
    %27 = arith.cmpi eq, %arg1, %c1_i32 : i32
    %28 = arith.extui %27 : i1 to i32
    %c0_i32_17 = arith.constant 0 : i32
    %29 = arith.cmpi ne, %28, %c0_i32_17 : i32
    scf.if %29 {
      %c0_18 = arith.constant 0 : index
      %c0_19 = arith.constant 0 : index
      %30 = vector.load %arg8[%c0_18, %c0_19] : memref<16x32xf32, #tpu.memory_space<vmem>>, vector<16x32xf32>
      %c0_20 = arith.constant 0 : index
      %c0_21 = arith.constant 0 : index
      %31 = vector.load %arg6[%c0_20, %c0_21] : memref<1x32xf32, #tpu.memory_space<vmem>>, vector<1x32xf32>
      %32 = vector.broadcast %31 : vector<1x32xf32> to vector<16x32xf32>
      %33 = arith.addf %30, %32 : vector<16x32xf32>
      %c0_22 = arith.constant 0 : index
      %c0_23 = arith.constant 0 : index
      %34 = vector.load %arg7[%c0_22, %c0_23] : memref<16x32xf32, #tpu.memory_space<vmem>>, vector<16x32xf32>
      tpu.vector_store %arg7[%c0_22, %c0_23], %33 {strides = array<i32>} : memref<16x32xf32, #tpu.memory_space<vmem>>, vector<16x32xf32>,
    } else {
    }
    return
  }
  func.func @transform_0(%arg0: i32, %arg1: i32) -> (i32, i32) {
    %c0_i32 = arith.constant 0 : i32
    %c0_i32_0 = arith.constant 0 : i32
    return %arg0, %c0_i32 : i32, i32
  }
  func.func @transform_1(%arg0: i32, %arg1: i32) -> (i32, i32) {
    %c0_i32 = arith.constant 0 : i32
    %c0_i32_0 = arith.constant 0 : i32
    return %c0_i32, %arg1 : i32, i32
  }
  func.func @transform_2(%arg0: i32, %arg1: i32) -> (i32, i32) {
    %c0_i32 = arith.constant 0 : i32
    %c0_i32_0 = arith.constant 0 : i32
    return %c0_i32, %arg1 : i32, i32
  }
  func.func @transform_3(%arg0: i32, %arg1: i32) -> (i32, i32) {
    %c0_i32 = arith.constant 0 : i32
    %c0_i32_0 = arith.constant 0 : i32
    return %arg1, %c0_i32 : i32, i32
  }
  func.func @transform_4(%arg0: i32, %arg1: i32) -> (i32, i32) {
    %c0_i32 = arith.constant 0 : i32
    %c0_i32_0 = arith.constant 0 : i32
    %c0_i32_1 = arith.constant 0 : i32
    return %c0_i32, %c0_i32_0 : i32, i32
  }
  func.func @transform_5(%arg0: i32, %arg1: i32) -> (i32, i32) {
    %c0_i32 = arith.constant 0 : i32
    %c0_i32_0 = arith.constant 0 : i32
    return %arg0, %c0_i32 : i32, i32
  }
}

</mosaic_0001>

<bundles_post_ra>
// kernel: tpu_custom_call.1
= control target key start
LH: loop header
LB: loop body
LE: loop exit
PB: predicated region body
PF: predicated region fallthrough
CT: control target
= control target key end

     0   :  { %10 = vsyncpa [#allocation5], 0  ;;  %s918_s18 = smov 0   ;;  %s920_s19 = smov 0   ;;  %s1049_s0 = inlined_call_operand.vmem [shape: f32[16,32], index: 0, kind: input, shape index: {}]   ;;  %s1050_s1 = inlined_call_operand.vmem [shape: f32[32,256], index: 1, kind: input, shape index: {}]   ;;  %s1051_s2 = inlined_call_operand.vmem [shape: f32[1,256], index: 2, kind: input, shape index: {}]   ;;  %s1052_s3 = inlined_call_operand.vmem [shape: f32[256,32], index: 3, kind: input, shape index: {}]   ;;  %s1053_s4 = inlined_call_operand.vmem [shape: f32[1,32], index: 4, kind: input, shape index: {}]   ;;  %s1054_s5 = inlined_call_operand.hbm [shape: f32[16,32], index: 5, kind: output, shape index: {}]  }
   0x1   :  { %s922_s20 = smov 0   ;;  %s924_s21 = smov 0  }
   0x2   :  { %s926_s22 = smov 0  }
   0x3 LB: > { %s672_s23 = sadd.s32 4294967295, %s882_s22   ;;  %s25_s24 = sadd.s32 1, %s878_s21  ;;  %s882_s22 = sphi %s926_s22, %s16_s22   ;;  %s878_s21 = sphi %s924_s21, %s1059_s21   ;;  %s874_s20 = sphi %s922_s20, %s1058_s20   ;;  %s870_s19 = sphi %s920_s19, %s1057_s19   ;;  %s866_s18 = sphi %s918_s18, %s1056_s18  }
   0x4   : > { %p26_p0 = scmp.ge.s32.totalorder %s25_s24, 2  ;;  %p68_p1 = scmp.ne.s32.totalorder %s870_s19, %s866_s18 }
   0x5   : > { %p69_p2 = scmp.eq.s32.totalorder %s882_s22, 0  ;;  %s61_s26 = sadd.s32 1, %s870_s19 }
   0x6   : > { %s1061_s24 = smov (%p26_p0, %s25_s24), 0  ;;  %p675_p5 = scmp.ge.s32.totalorder %s882_s22, 2 }
   0x7   : > { %p70_p3 = por %p69_p2, %p68_p1  ;;  %s58_s25 = ssub.s32 %s878_s21, %s1061_s24 }
   0x8   : > { %p59_p4 = scmp.eq.s32.totalorder %s58_s25, 0  ;;  %205 = sbr.rel (%p675_p5) target bundleno = 19 (0x13), region = 24 }
   0xa   : > { %s954_s27 = scalar_select %p59_p4, %s870_s19, %s61_s26  }
   0xd   : > { %208 = sbr.rel (!%p70_p3) target bundleno = 19 (0x13), region = 28  ;;  %s210_s28 = sand.u32 (%p70_p3), 1, %s870_s19  }
   0xe   : > { %s677_s29 = sshll.u32 (%p70_p3), %s878_s21, 3  ;;  %s676_s30 = sshll.u32 (%p70_p3), %s210_s28, 5 }
   0xf   : > { %s214_s8 = scalar_lea.vmem (%p70_p3), %s1050_s1, %s677_s29  ;;  %s212_s9 = scalar_lea.vmem (%p70_p3), [#allocation3], %s676_s30 }
  0x10   : > { %v249_v0 = vld [vmem:[%s214_s8] sm:$0xff] (%p70_p3)  ;;  %v251_v1 = vld [vmem:[%s214_s8 + $0x10] sm:$0xff] (%p70_p3) }
  0x11   : > { %v253_v2 = vld [vmem:[%s214_s8 + $0x20] sm:$0xff] (%p70_p3)  ;;  %250 = vst [vmem:[%s212_s9] sm:$0xff] (%p70_p3), %v249_v0  ;;  %252 = vst [vmem:[%s212_s9 + $0x8] sm:$0xff] (%p70_p3), %v251_v1  ;;  %v255_v3 = vld [vmem:[%s214_s8 + $0x30] sm:$0xff] (%p70_p3) }
  0x12   : > { %254 = vst [vmem:[%s212_s9 + $0x10] sm:$0xff] %v253_v2  ;;  %256 = vst [vmem:[%s212_s9 + $0x18] sm:$0xff] %v255_v3 }
  0x13 PF: > { %p678_p6 = scmp.ge.s32.totalorder %s882_s22, 1  ;;  %p276_p7 = scmp.lt.s32.totalorder %s882_s22, 3 }
  0x15   : > { %p277_p8 = pnand %p678_p6, %p276_p7 }
  0x16   : > { %s283_s10 = sand.u32 (!%p277_p8), 1, %s866_s18   ;;  %p324_p9 = scmp.lt.s32.totalorder (!%p277_p8), %s874_s20, 1 }
  0x17   : > { %280 = sbr.rel (%p277_p8) target bundleno = 495 (0x1ef), region = 74  ;;  %s679_s11 = sshll.u32 (!%p277_p8), %s283_s10, 5 }
  0x18   : > { %s680_s12 = sshll.u32 (!%p277_p8), %s874_s20, 4  ;;  %s285_s29 = scalar_lea.vmem (!%p277_p8), [#allocation3], %s679_s11 }
  0x19   : > { %p328_p10 = scmp.lt.s32.totalorder (!%p277_p8), %s680_s12, 31  ;;  %p682_p11 = scmp.ne.s32.totalorder (!%p277_p8), %s874_s20, 0 }
  0x1c   : > { %s968_s13 = scalar_select %p324_p9, %s874_s20, 1 }
  0x1d   : > { %s1063_s12 = smov (!%p328_p10, %s680_s12), 31  ;;  %337 = sbr.rel (%p682_p11) target bundleno = 36 (0x24), region = 82 }
  0x1e   : > { %s326_s16 = scalar_lea.vmem %s1051_s2, %s968_s13  ;;  %s681_s17 = sshll.u32 %s1063_s12, 3 }
  0x1f   : > { %s977_s28 = scalar_lea.vmem %s1052_s3, %s681_s17 }
  0x22   : > { %vm338_vm0 = vcmask 261120   ;;  %v884_v4 = vmov 0.0  }
  0x23   : > { %339 = vst.msk [vmem:[#allocation2] sm:$0xff] %vm338_vm0, %v884_v4  ;;  %340 = vst.msk [vmem:[#allocation2 + $0x8] sm:$0xff] %vm338_vm0, %v884_v4 }
  0x24 PF: > { %v346_v5 = vld [vmem:[%s285_s29 + $0x18] sm:$0xff]  ;;  %v345_v6 = vld [vmem:[%s285_s29 + $0x10] sm:$0xff]  ;;  %vm354_vm1 = vcmask 261120   ;;  %v344_v8 = vld [vmem:[%s285_s29 + $0x8] sm:$0xff]  ;;  %p686_p12 = scmp.ne.s32.totalorder %s874_s20, 1 }
  0x25   : > { %716 = vmatprep.subr.mxu0 %v346_v5  ;;  %v341_v7 = vld [vmem:[%s1049_s0] sm:$0xff]  ;;  %v343_v9 = vld [vmem:[%s285_s29] sm:$0xff]  ;;  %v342_v10 = vld [vmem:[%s1049_s0 + $0x8] sm:$0xff] }
  0x26   : > { %717 = vmatpush3.msra.mxu0 %v346_v5  ;;  %724 = vmatprep.mubr.msk.f32.mxu0 %vm354_vm1, %v341_v7  ;;  %v471_v11 = vld [vmem:[%s977_s28 + $0x78] sm:$0xff]  ;;  %v470_v12 = vld [vmem:[%s977_s28 + $0x70] sm:$0xff]  ;;  %v469_v13 = vld [vmem:[%s977_s28 + $0x68] sm:$0xff] }
  0x27   : > { %718 = vmatprep.subr.mxu0 %v345_v6  ;;  %727 = vmatprep.subr.mxu1 %v471_v11  ;;  %v468_v14 = vld [vmem:[%s977_s28 + $0x60] sm:$0xff]  ;;  %v467_v15 = vld [vmem:[%s977_s28 + $0x58] sm:$0xff]  ;;  %v466_v16 = vld [vmem:[%s977_s28 + $0x50] sm:$0xff] }
  0x28   : > { %719 = vmatpush3.msra.mxu0 %v345_v6  ;;  %728 = vmatpush3.msra.mxu1 %v471_v11  ;;  %v465_v17 = vld [vmem:[%s977_s28 + $0x48] sm:$0xff]  ;;  %v464_v18 = vld [vmem:[%s977_s28 + $0x40] sm:$0xff]  ;;  %v463_v19 = vld [vmem:[%s977_s28 + $0x38] sm:$0xff] }
  0x29   : > { %720 = vmatprep.subr.mxu0 %v344_v8  ;;  %729 = vmatprep.subr.mxu1 %v470_v12  ;;  %v462_v20 = vld [vmem:[%s977_s28 + $0x30] sm:$0xff]  ;;  %v461_v21 = vld [vmem:[%s977_s28 + $0x28] sm:$0xff]  ;;  %v460_v22 = vld [vmem:[%s977_s28 + $0x20] sm:$0xff] }
  0x2a   : > { %721 = vmatpush3.msra.mxu0 %v344_v8  ;;  %730 = vmatpush3.msra.mxu1 %v470_v12  ;;  %v459_v23 = vld [vmem:[%s977_s28 + $0x18] sm:$0xff]  ;;  %v458_v24 = vld [vmem:[%s977_s28 + $0x10] sm:$0xff]  ;;  %v457_v25 = vld [vmem:[%s977_s28 + $0x8] sm:$0xff] }
  0x2b   : > { %722 = vmatprep.subr.mxu0 %v343_v9  ;;  %731 = vmatprep.subr.mxu1 %v469_v13  ;;  %v456_v26 = vld [vmem:[%s977_s28] sm:$0xff]  ;;  %v455_v50 = vld [vmem:[#allocation2 + $0x8] sm:$0xff] }
  0x2c   : > { %723 = vmatpush3.msra.mxu0 %v343_v9  ;;  %732 = vmatpush3.msra.mxu1 %v469_v13  ;;  %v683_v27 = vld [vmem:[%s326_s16] ss:$0 sm:$0xff] }
  0x2d   : > { %725 = vmatmul.mubr.msk.f32.vlgmr.msra.gmra.mxu0 %vm354_vm1, %v342_v10  ;;  %733 = vmatprep.subr.mxu1 %v468_v14  ;;  %v454_v52 = vld [vmem:[#allocation2] sm:$0xff] }
  0x2e   : > { %734 = vmatpush3.msra.mxu1 %v468_v14 }
  0x2f   : > { %735 = vmatprep.subr.mxu1 %v467_v15 }
  0x30   : > { %736 = vmatpush3.msra.mxu1 %v467_v15 }
  0x31   : > { %737 = vmatprep.subr.mxu1 %v466_v16 }
  0x32   : > { %738 = vmatpush3.msra.mxu1 %v466_v16 }
  0x33   : > { %739 = vmatprep.subr.mxu1 %v465_v17 }
  0x34   : > { %740 = vmatpush3.msra.mxu1 %v465_v17 }
  0x35   : > { %741 = vmatprep.subr.mxu1 %v464_v18 }
  0x36   : > { %742 = vmatpush3.msra.mxu1 %v464_v18 }
  0x37   : > { %743 = vmatprep.subr.mxu1 %v463_v19 }
  0x38   : > { %744 = vmatpush3.msra.mxu1 %v463_v19 }
  0x39   : > { %745 = vmatprep.subr.mxu1 %v462_v20 }
  0x3a   : > { %746 = vmatpush3.msra.mxu1 %v462_v20 }
  0x3b   : > { %747 = vmatprep.subr.mxu1 %v461_v21 }
  0x3c   : > { %748 = vmatpush3.msra.mxu1 %v461_v21 }
  0x3d   : > { %749 = vmatprep.subr.mxu1 %v460_v22 }
  0x3e   : > { %750 = vmatpush3.msra.mxu1 %v460_v22 }
  0x3f   : > { %751 = vmatprep.subr.mxu1 %v459_v23 }
  0x40   : > { %752 = vmatpush3.msra.mxu1 %v459_v23 }
  0x41   : > { %753 = vmatprep.subr.mxu1 %v458_v24 }
  0x42   : > { %754 = vmatpush3.msra.mxu1 %v458_v24 }
  0x43   : > { %755 = vmatprep.subr.mxu1 %v457_v25 }
  0x44   : > { %756 = vmatpush3.msra.mxu1 %v457_v25 }
  0x45   : > { %757 = vmatprep.subr.mxu1 %v456_v26 }
  0x46   : > { %758 = vmatpush3.msra.mxu1 %v456_v26 }
  0xed   : > { %v726_v28 = vpop.f32.mrf.mxu0 }
  0xee   : > { %v433_v29 = vadd.f32 %v726_v28, %v683_v27 }
  0xef   : > { %v427_v30 = vpop.f32.mrf.mxu0 }
  0xf0   : > { %v439_v31 = vmul.f32 0.044715, %v433_v29  ;;  %v428_v32 = vadd.f32 %v683_v27, %v427_v30  ;;  %v437_v47 = vmul.f32 0.5, %v433_v29 }
  0xf2   : > { %v441_v33 = vmul.f32 %v439_v31, %v433_v29  ;;  %v438_v34 = vmul.f32 0.044715, %v428_v32  ;;  %v436_v45 = vmul.f32 0.5, %v428_v32 }
  0xf4   : > { %v440_v35 = vmul.f32 %v438_v34, %v428_v32  ;;  %v443_v36 = vmul.f32 %v441_v33, %v433_v29 }
  0xf6   : > { %v442_v37 = vmul.f32 %v440_v35, %v428_v32  ;;  %v445_v38 = vadd.f32 %v443_v36, %v433_v29 }
  0xf8   : > { %v444_v39 = vadd.f32 %v442_v37, %v428_v32  ;;  %v447_v40 = vmul.f32 0.7978846, %v445_v38 }
  0xfa   : > { %v446_v41 = vmul.f32 0.7978846, %v444_v39  ;;  %812 = vtanh.f32 %v447_v40 }
  0xfc   : > { %814 = vtanh.f32 %v446_v41 }
 0x107   : > { %v813_v42 = vpop.eup %812 }
 0x108   : > { %v451_v44 = vadd.f32 1.0, %v813_v42 }
 0x109   : > { %v815_v43 = vpop.eup %814 }
 0x10a   : > { %v450_v46 = vadd.f32 1.0, %v815_v43  ;;  %v453_v49 = vmul.f32 %v451_v44, %v437_v47 }
 0x10c   : > { %v452_v48 = vmul.f32 %v450_v46, %v436_v45 }
 0x10e   : > { %759 = vmatprep.mubr.f32.mxu1 %v452_v48 }
 0x10f   : > { %760 = vmatmul.mubr.f32.vlgmr.msra.gmra.mxu1 %v453_v49 }
 0x1cf   : > { %v761_v51 = vpop.f32.mrf.mxu1 }
 0x1d0   : > { %v548_v53 = vadd.f32 %v761_v51, %v455_v50  ;;  %554 = sbr.rel (%p686_p12) target bundleno = 479 (0x1df), region = 86 }
 0x1d1   : > { %v538_v54 = vpop.f32.mrf.mxu1 }
 0x1d2   : > { %550 = vst.msk [vmem:[#allocation2 + $0x8] sm:$0xff] %vm354_vm1, %v548_v53  ;;  %v547_v55 = vadd.f32 %v538_v54, %v454_v52 }
 0x1d4   : > { %549 = vst.msk [vmem:[#allocation2] sm:$0xff] %vm354_vm1, %v547_v55 }
 0x1d5   : > { %v687_v57 = vld [vmem:[%s1053_s4] ss:$0 sm:$0xff] }
 0x1d9   : > { %v556_v58 = vld [vmem:[#allocation2 + $0x8] sm:$0xff] }
 0x1da   : > { %v565_v60 = vadd.f32 %v687_v57, %v556_v58 }
 0x1db   : > { %v555_v56 = vld [vmem:[#allocation2] sm:$0xff] }
 0x1dc   : > { %v564_v59 = vadd.f32 %v687_v57, %v555_v56  ;;  %567 = vst.msk [vmem:[#allocation4 + $0x8] sm:$0xff] %vm354_vm1, %v565_v60 }
 0x1de   : > { %566 = vst.msk [vmem:[#allocation4] sm:$0xff] %vm354_vm1, %v564_v59 }
 0x1df PF: > { %p1019_p13 = scmp.eq.s32.totalorder %s672_s23, 1  ;;  %s885_s20 = smov [#allocation4]  }
 0x1e0   : > { %s577_s13 = sshll.u32 %s885_s20, 4  ;;  %s578_s13 = int_to_ptr.vmem [resolvable:$true] %s577_s13 }
 0x1e1   : > { %s816_s14 = scalar_lea.vmem %s578_s13, 256  ;;  %p823_p3 = scmp.lt.s32.totalorder %s578_s13, %s578_s13 }
 0x1e2   : > { %p817_p0 = scmp.ne.s32.totalorder %s578_s13, %s816_s14  ;;  %p824_p4 = scmp.lt.s32.totalorder %s816_s14, %s816_s14 }
 0x1e4   : > { %p818_p1 = pnand %p817_p0, %p1019_p13  ;;  %p825_p5 = por %p824_p4, %p823_p3 }
 0x1e6   : > { %p819_p2 = pneg %p818_p1 }
 0x1e8   : > { %p826_p6 = pnand %p825_p5, %p819_p2 }
 0x1ea   : > { %829 = shalt.err (!%p826_p6)
}
 0x1eb   : > { %s886_s15 = smov 128   ;;  %s887_s23 = smov 8  }
 0x1ec   : > { %763 = dma.vmem_to_hbm [thread:$0]  (%p1019_p13), %s578_s13, 256, %s1054_s5, [#allocation5], %s886_s15, %s886_s15, %s887_s23  }
 0x1ed   : > { %861 = dma.done.wait (%p1019_p13), [#allocation5], 256  }
 0x1ee   : > { %863 = vsyncadd (%p1019_p13), [#allocation5], 4294967040 }
 0x1ef PF: > { %s16_s22 = sadd.s32 1, %s882_s22   ;;  %s1056_s18 = smov %s870_s19 }
 0x1f0   : > { %p13_p7 = scmp.ge.s32.totalorder %s16_s22, 4   ;;  %s1057_s19 = smov %s954_s27 }
 0x1f1   : > { %s1058_s20 = smov %s878_s21  ;;  %s1059_s21 = smov %s1061_s24 }
 0x1f2   :  { %15 = sbr.rel (!%p13_p7) target bundleno = 3 (0x3), region = 128 }
 0x1f7   :  { %593 = vsyncpa [#allocation5], 1 }
 0x1f8   :  { %595 = vsyncpa [#allocation5 + $0x1], 1 }

</bundles_post_ra>
